<compile_context>
chip_gen: v5e
topology: v5e:2x2
jax: 0.10.0
libtpu: 0.0.40
codegen_flags: <defaults>
</compile_context>

<pallas_src>
from functools import partial

import jax
import jax.numpy as jnp
from jax.experimental import pallas as pl
from jax.experimental.pallas import tpu as pltpu


def _round_up(x, m):
    return (x + m - 1) // m * m


# ----------------------------------------------------------------------------
# Kernel: fused 4-layer MLP (matmul + bias + ReLU) on one (tb, :) batch tile.
# Inputs arrive in f32 and are cast to bf16 in-kernel; all dots take bf16
# operands and accumulate in f32 on the MXU; bias add + ReLU in f32.
# ----------------------------------------------------------------------------
def _actor_mlp_kernel(x_ref,
                      w0_ref, b0_ref,
                      w1_ref, b1_ref,
                      w2_ref, b2_ref,
                      w3_ref, b3_ref,
                      out_ref):
    x = x_ref[...].astype(jnp.bfloat16)                       # (tb, 32)

    h = jnp.dot(x, w0_ref[...], preferred_element_type=jnp.float32) + b0_ref[...]
    h = jnp.maximum(h, 0.0).astype(jnp.bfloat16)

    h = jnp.dot(h, w1_ref[...], preferred_element_type=jnp.float32) + b1_ref[...]
    h = jnp.maximum(h, 0.0).astype(jnp.bfloat16)

    h = jnp.dot(h, w2_ref[...], preferred_element_type=jnp.float32) + b2_ref[...]
    h = jnp.maximum(h, 0.0).astype(jnp.bfloat16)

    h = jnp.dot(h, w3_ref[...], preferred_element_type=jnp.float32) + b3_ref[...]
    out_ref[...] = jnp.maximum(h, 0.0).astype(out_ref.dtype)  # bf16, lane-dense


def _resident_spec(shape):
    # Whole-array block, same block index every grid step -> stays VMEM-resident.
    return pl.BlockSpec(shape, lambda i: tuple(0 for _ in shape))


# ----------------------------------------------------------------------------
# One-time parameter preparation (run at init, NOT per forward call).
# ----------------------------------------------------------------------------
def prepare_actor_params(params):
    """Cast weights to bf16, biases to f32, and pad the last layer to 128 lanes."""
    w0, b0, w1, b1, w2, b2, w3, b3 = params
    num_actions = w3.shape[1]
    na_pad = max(128, _round_up(num_actions, 128))

    w3_p = jnp.zeros((w3.shape[0], na_pad), jnp.bfloat16).at[:, :num_actions].set(
        w3.astype(jnp.bfloat16))
    b3_p = jnp.zeros((1, na_pad), jnp.float32).at[:, :num_actions].set(
        b3.astype(jnp.float32))

    prepared = (
        w0.astype(jnp.bfloat16), b0.astype(jnp.float32),
        w1.astype(jnp.bfloat16), b1.astype(jnp.float32),
        w2.astype(jnp.bfloat16), b2.astype(jnp.float32),
        w3_p, b3_p,
    )
    return prepared, num_actions


# ----------------------------------------------------------------------------
# Forward pass (jitted; params already prepared).
# ----------------------------------------------------------------------------
@partial(jax.jit, static_argnames=("num_actions",))
def actor_forward(obs, feat, prepared, *, num_actions):
    """obs: (B, N, 4) f32, feat: (B, 8) f32 -> action_probs: (B, num_actions) f32."""
    B = obs.shape[0]
    obs_dim = obs.shape[1] * obs.shape[2]          # N*4
    feat_dim = feat.shape[-1]                      # 8
    in_dim = obs_dim + feat_dim

    w0b, b0f, w1b, b1f, w2b, b2f, w3p, b3p = prepared
    na_pad = w3p.shape[1]

    # --- batch tiling: >=2 grid steps once B > 32 (v7x megacore), big tiles ---
    TB_MAX = 512
    if B > 32:
        tb = min(TB_MAX, _round_up(pl.cdiv(B, 2), 16))   # 16 = bf16 sublane pack
    else:
        tb = _round_up(B, 16)
    B_pad = _round_up(B, tb)
    grid = (B_pad // tb,)

    # --- single concatenated f32 input; pad batch only when ragged -----------
    x = jnp.concatenate([obs.reshape(B, obs_dim), feat.reshape(B, feat_dim)],
                        axis=-1)
    if B_pad != B:
        x = jnp.pad(x, ((0, B_pad - B), (0, 0)))   # zero rows, sliced off below

    in_specs = [pl.BlockSpec((tb, in_dim), lambda i: (i, 0))] + [
        _resident_spec(a.shape)
        for a in (w0b, b0f, w1b, b1f, w2b, b2f, w3p, b3p)
    ]
    out_spec = pl.BlockSpec((tb, na_pad), lambda i: (i, 0))

    out_padded = pl.pallas_call(
        _actor_mlp_kernel,
        out_shape=jax.ShapeDtypeStruct((B_pad, na_pad), jnp.bfloat16),
        grid=grid,
        in_specs=in_specs,
        out_specs=out_spec,
        compiler_params=pltpu.CompilerParams(
            dimension_semantics=("parallel",),
            vmem_limit_bytes=16 << 20,
        ),
    )(x, w0b, b0f, w1b, b1f, w2b, b2f, w3p, b3p)

    # Tiny slice + single f32 cast outside the kernel (keeps writeback bf16).
    return out_padded[:B, :num_actions].astype(jnp.float32)


# ----------------------------------------------------------------------------
# Synthetic init + pure-JAX reference
# ----------------------------------------------------------------------------
def init_actor_params(key, n_agents, num_actions):
    """Deterministic synthetic parameter init (shapes from Actor.__init__)."""
    in_dim = n_agents * 4 + 8
    dims = [(in_dim, 128), (128, 256), (256, 256), (256, num_actions)]
    params = []
    for d_in, d_out in dims:
        kw, kb, key = jax.random.split(key, 3)
        scale = 1.0 / jnp.sqrt(jnp.float32(d_in))
        w = jax.random.uniform(kw, (d_in, d_out), jnp.float32, -scale, scale)
        b = jax.random.uniform(kb, (1, d_out), jnp.float32, -scale, scale)
        params += [w, b]
    return tuple(params)


def _reference_forward(obs, feat, params):
    """Pure-JAX f32 reference matching the PyTorch forward."""
    B = obs.shape[0]
    h = jnp.concatenate([obs.reshape(B, -1), feat.reshape(B, -1)], axis=-1)
    w0, b0, w1, b1, w2, b2, w3, b3 = params
    h = jnp.maximum(h @ w0 + b0, 0.0)
    h = jnp.maximum(h @ w1 + b1, 0.0)
    h = jnp.maximum(h @ w2 + b2, 0.0)
    h = jnp.maximum(h @ w3 + b3, 0.0)
    return h


if __name__ == "__main__":
    key = jax.random.PRNGKey(0)
    B = 2            # batch
    N = 6            # args.N -> obs_dim = N*4 = 24, total in_dim = 32
    NUM_ACTIONS = 16

    k_obs, k_feat, k_par = jax.random.split(key, 3)
    obs = jax.random.normal(k_obs, (B, N, 4), jnp.float32)
    feat = jax.random.normal(k_feat, (B, 8), jnp.float32)
    params = init_actor_params(k_par, N, NUM_ACTIONS)

    # One-time weight prep (hoisted out of the per-step forward).
    prepared, num_actions = prepare_actor_params(params)
    prepared = jax.block_until_ready(prepared)

    action_probs = actor_forward(obs, feat, prepared, num_actions=num_actions)
    jax.block_until_ready(action_probs)

    ref = _reference_forward(obs, feat, params)
    assert action_probs.shape == (B, NUM_ACTIONS)
    # bf16 matmul operands + bf16 writeback with f32 accumulation -> small
    # relative error vs the f32 reference.
    assert jnp.allclose(action_probs, ref, atol=7.5e-2, rtol=7.5e-2)

    # NOTE: reference calls the output "action_probs" but applies ReLU, not
    # softmax, so values are unnormalized (matches the PyTorch module).
    # TODO(synk): .detach().cpu() in the PyTorch module is a host transfer;
    # we return a device array instead.
    print("KERNEL_OK")
</pallas_src>

<mosaic_0001>
module attributes {stable_mosaic.version = 11 : i64} {
  func.func @_actor_mlp_kernel(%arg0: i32, %arg1: memref<16x32xf32, #tpu.memory_space<vmem>>, %arg2: memref<32x128xbf16, #tpu.memory_space<vmem>>, %arg3: memref<1x128xf32, #tpu.memory_space<vmem>>, %arg4: memref<128x256xbf16, #tpu.memory_space<vmem>>, %arg5: memref<1x256xf32, #tpu.memory_space<vmem>>, %arg6: memref<256x256xbf16, #tpu.memory_space<vmem>>, %arg7: memref<1x256xf32, #tpu.memory_space<vmem>>, %arg8: memref<256x128xbf16, #tpu.memory_space<vmem>>, %arg9: memref<1x128xf32, #tpu.memory_space<vmem>>, %arg10: memref<16x128xbf16, #tpu.memory_space<vmem>>) attributes {dimension_semantics = [#tpu.dimension_semantics<parallel>], iteration_bounds = array<i64: 1>, scalar_prefetch = 0 : i64, scratch_operands = 0 : i64, tpu.core_type = #tpu.core_type<tc>, window_params = [{transform_indices = @transform_0, window_bounds = array<i64: 16, 32>}, {pipeline_mode = #tpu.pipeline_mode<synchronous>, transform_indices = @transform_1, window_bounds = array<i64: 32, 128>}, {pipeline_mode = #tpu.pipeline_mode<synchronous>, transform_indices = @transform_2, window_bounds = array<i64: 1, 128>}, {pipeline_mode = #tpu.pipeline_mode<synchronous>, transform_indices = @transform_3, window_bounds = array<i64: 128, 256>}, {pipeline_mode = #tpu.pipeline_mode<synchronous>, transform_indices = @transform_4, window_bounds = array<i64: 1, 256>}, {pipeline_mode = #tpu.pipeline_mode<synchronous>, transform_indices = @transform_5, window_bounds = array<i64: 256, 256>}, {pipeline_mode = #tpu.pipeline_mode<synchronous>, transform_indices = @transform_6, window_bounds = array<i64: 1, 256>}, {pipeline_mode = #tpu.pipeline_mode<synchronous>, transform_indices = @transform_7, window_bounds = array<i64: 256, 128>}, {pipeline_mode = #tpu.pipeline_mode<synchronous>, transform_indices = @transform_8, window_bounds = array<i64: 1, 128>}, {transform_indices = @transform_9, window_bounds = array<i64: 16, 128>}]} {
    %c0 = arith.constant 0 : index
    %c0_0 = arith.constant 0 : index
    %0 = vector.load %arg1[%c0, %c0_0] : memref<16x32xf32, #tpu.memory_space<vmem>>, vector<16x32xf32>
    %1 = arith.truncf %0 : vector<16x32xf32> to vector<16x32xbf16>
    %c0_1 = arith.constant 0 : index
    %c0_2 = arith.constant 0 : index
    %2 = vector.load %arg2[%c0_1, %c0_2] : memref<32x128xbf16, #tpu.memory_space<vmem>>, vector<32x128xbf16>
    %cst = arith.constant dense<0.000000e+00> : vector<16x128xf32>
    %3 = tpu.matmul %1, %2, %cst {dimension_numbers = #tpu.dot_dimension_numbers<[1], [0], [0], [1], [0, 0, 1, 1], [], []>} : vector<16x32xbf16>, vector<32x128xbf16>, vector<16x128xf32> -> vector<16x128xf32>
    %c0_3 = arith.constant 0 : index
    %c0_4 = arith.constant 0 : index
    %4 = vector.load %arg3[%c0_3, %c0_4] : memref<1x128xf32, #tpu.memory_space<vmem>>, vector<1x128xf32>
    %5 = vector.broadcast %4 : vector<1x128xf32> to vector<16x128xf32>
    %6 = arith.addf %3, %5 : vector<16x128xf32>
    %cst_5 = arith.constant 0.000000e+00 : f32
    %7 = vector.broadcast %cst_5 : f32 to vector<16x128xf32>
    %8 = arith.maximumf %6, %7 : vector<16x128xf32>
    %9 = arith.truncf %8 : vector<16x128xf32> to vector<16x128xbf16>
    %c0_6 = arith.constant 0 : index
    %c0_7 = arith.constant 0 : index
    %10 = vector.load %arg4[%c0_6, %c0_7] : memref<128x256xbf16, #tpu.memory_space<vmem>>, vector<128x256xbf16>
    %cst_8 = arith.constant dense<0.000000e+00> : vector<16x256xf32>
    %11 = tpu.matmul %9, %10, %cst_8 {dimension_numbers = #tpu.dot_dimension_numbers<[1], [0], [0], [1], [0, 0, 1, 1], [], []>} : vector<16x128xbf16>, vector<128x256xbf16>, vector<16x256xf32> -> vector<16x256xf32>
    %c0_9 = arith.constant 0 : index
    %c0_10 = arith.constant 0 : index
    %12 = vector.load %arg5[%c0_9, %c0_10] : memref<1x256xf32, #tpu.memory_space<vmem>>, vector<1x256xf32>
    %13 = vector.broadcast %12 : vector<1x256xf32> to vector<16x256xf32>
    %14 = arith.addf %11, %13 : vector<16x256xf32>
    %cst_11 = arith.constant 0.000000e+00 : f32
    %15 = vector.broadcast %cst_11 : f32 to vector<16x256xf32>
    %16 = arith.maximumf %14, %15 : vector<16x256xf32>
    %17 = arith.truncf %16 : vector<16x256xf32> to vector<16x256xbf16>
    %c0_12 = arith.constant 0 : index
    %c0_13 = arith.constant 0 : index
    %18 = vector.load %arg6[%c0_12, %c0_13] : memref<256x256xbf16, #tpu.memory_space<vmem>>, vector<256x256xbf16>
    %cst_14 = arith.constant dense<0.000000e+00> : vector<16x256xf32>
    %19 = tpu.matmul %17, %18, %cst_14 {dimension_numbers = #tpu.dot_dimension_numbers<[1], [0], [0], [1], [0, 0, 1, 1], [], []>} : vector<16x256xbf16>, vector<256x256xbf16>, vector<16x256xf32> -> vector<16x256xf32>
    %c0_15 = arith.constant 0 : index
    %c0_16 = arith.constant 0 : index
    %20 = vector.load %arg7[%c0_15, %c0_16] : memref<1x256xf32, #tpu.memory_space<vmem>>, vector<1x256xf32>
    %21 = vector.broadcast %20 : vector<1x256xf32> to vector<16x256xf32>
    %22 = arith.addf %19, %21 : vector<16x256xf32>
    %cst_17 = arith.constant 0.000000e+00 : f32
    %23 = vector.broadcast %cst_17 : f32 to vector<16x256xf32>
    %24 = arith.maximumf %22, %23 : vector<16x256xf32>
    %25 = arith.truncf %24 : vector<16x256xf32> to vector<16x256xbf16>
    %c0_18 = arith.constant 0 : index
    %c0_19 = arith.constant 0 : index
    %26 = vector.load %arg8[%c0_18, %c0_19] : memref<256x128xbf16, #tpu.memory_space<vmem>>, vector<256x128xbf16>
    %cst_20 = arith.constant dense<0.000000e+00> : vector<16x128xf32>
    %27 = tpu.matmul %25, %26, %cst_20 {dimension_numbers = #tpu.dot_dimension_numbers<[1], [0], [0], [1], [0, 0, 1, 1], [], []>} : vector<16x256xbf16>, vector<256x128xbf16>, vector<16x128xf32> -> vector<16x128xf32>
    %c0_21 = arith.constant 0 : index
    %c0_22 = arith.constant 0 : index
    %28 = vector.load %arg9[%c0_21, %c0_22] : memref<1x128xf32, #tpu.memory_space<vmem>>, vector<1x128xf32>
    %29 = vector.broadcast %28 : vector<1x128xf32> to vector<16x128xf32>
    %30 = arith.addf %27, %29 : vector<16x128xf32>
    %cst_23 = arith.constant 0.000000e+00 : f32
    %31 = vector.broadcast %cst_23 : f32 to vector<16x128xf32>
    %32 = arith.maximumf %30, %31 : vector<16x128xf32>
    %33 = arith.truncf %32 : vector<16x128xf32> to vector<16x128xbf16>
    %c0_24 = arith.constant 0 : index
    %c0_25 = arith.constant 0 : index
    %34 = vector.load %arg10[%c0_24, %c0_25] : memref<16x128xbf16, #tpu.memory_space<vmem>>, vector<16x128xbf16>
    tpu.vector_store %arg10[%c0_24, %c0_25], %33 {strides = array<i32>} : memref<16x128xbf16, #tpu.memory_space<vmem>>, vector<16x128xbf16>,
    return
  }
  func.func @transform_0(%arg0: i32) -> (i32, i32) {
    %c0_i32 = arith.constant 0 : i32
    %c0_i32_0 = arith.constant 0 : i32
    return %arg0, %c0_i32 : i32, i32
  }
  func.func @transform_1(%arg0: i32) -> (i32, i32) {
    %c0_i32 = arith.constant 0 : i32
    %c0_i32_0 = arith.constant 0 : i32
    %c0_i32_1 = arith.constant 0 : i32
    return %c0_i32, %c0_i32_0 : i32, i32
  }
  func.func @transform_2(%arg0: i32) -> (i32, i32) {
    %c0_i32 = arith.constant 0 : i32
    %c0_i32_0 = arith.constant 0 : i32
    %c0_i32_1 = arith.constant 0 : i32
    return %c0_i32, %c0_i32_0 : i32, i32
  }
  func.func @transform_3(%arg0: i32) -> (i32, i32) {
    %c0_i32 = arith.constant 0 : i32
    %c0_i32_0 = arith.constant 0 : i32
    %c0_i32_1 = arith.constant 0 : i32
    return %c0_i32, %c0_i32_0 : i32, i32
  }
  func.func @transform_4(%arg0: i32) -> (i32, i32) {
    %c0_i32 = arith.constant 0 : i32
    %c0_i32_0 = arith.constant 0 : i32
    %c0_i32_1 = arith.constant 0 : i32
    return %c0_i32, %c0_i32_0 : i32, i32
  }
  func.func @transform_5(%arg0: i32) -> (i32, i32) {
    %c0_i32 = arith.constant 0 : i32
    %c0_i32_0 = arith.constant 0 : i32
    %c0_i32_1 = arith.constant 0 : i32
    return %c0_i32, %c0_i32_0 : i32, i32
  }
  func.func @transform_6(%arg0: i32) -> (i32, i32) {
    %c0_i32 = arith.constant 0 : i32
    %c0_i32_0 = arith.constant 0 : i32
    %c0_i32_1 = arith.constant 0 : i32
    return %c0_i32, %c0_i32_0 : i32, i32
  }
  func.func @transform_7(%arg0: i32) -> (i32, i32) {
    %c0_i32 = arith.constant 0 : i32
    %c0_i32_0 = arith.constant 0 : i32
    %c0_i32_1 = arith.constant 0 : i32
    return %c0_i32, %c0_i32_0 : i32, i32
  }
  func.func @transform_8(%arg0: i32) -> (i32, i32) {
    %c0_i32 = arith.constant 0 : i32
    %c0_i32_0 = arith.constant 0 : i32
    %c0_i32_1 = arith.constant 0 : i32
    return %c0_i32, %c0_i32_0 : i32, i32
  }
  func.func @transform_9(%arg0: i32) -> (i32, i32) {
    %c0_i32 = arith.constant 0 : i32
    %c0_i32_0 = arith.constant 0 : i32
    return %arg0, %c0_i32 : i32, i32
  }
}

</mosaic_0001>

<bundles_post_ra>
// kernel: actor_forward.1
= control target key start
LH: loop header
LB: loop body
LE: loop exit
PB: predicated region body
PF: predicated region fallthrough
CT: control target
= control target key end

     0   :  { %14 = vsyncpa [#allocation3], 0  ;;  %s1206_s0 = inlined_call_operand.vmem [shape: f32[16,32], index: 0, kind: input, shape index: {}]   ;;  %s1207_s1 = inlined_call_operand.vmem [shape: bf16[32,128], index: 1, kind: input, shape index: {}]   ;;  %s1208_s2 = inlined_call_operand.vmem [shape: f32[1,128], index: 2, kind: input, shape index: {}]   ;;  %s1209_s3 = inlined_call_operand.hbm [shape: bf16[128,256], index: 3, kind: input, shape index: {}]   ;;  %s1210_s4 = inlined_call_operand.vmem [shape: f32[1,256], index: 4, kind: input, shape index: {}]   ;;  %s1211_s5 = inlined_call_operand.hbm [shape: bf16[256,256], index: 5, kind: input, shape index: {}]   ;;  %s1212_s6 = inlined_call_operand.vmem [shape: f32[1,256], index: 6, kind: input, shape index: {}]   ;;  %s1213_s7 = inlined_call_operand.hbm [shape: bf16[256,128], index: 7, kind: input, shape index: {}]   ;;  %s1214_s8 = inlined_call_operand.vmem [shape: f32[1,128], index: 8, kind: input, shape index: {}]   ;;  %s1215_s9 = inlined_call_operand.vmem [shape: bf16[16,128], index: 9, kind: output, shape index: {}]  }
   0x1   :  { %15 = vsyncpa [#allocation5], 0  ;;  %s41_s11 = sshll.u32 %s1211_s5, 4  ;;  %s1113_s12 = smov [#allocation4]   ;;  %s42_s11 = int_to_ptr.hbm [resolvable:$true] %s41_s11 }
   0x2   :  { %s43_s13 = sshll.u32 %s1113_s12, 4  ;;  %s26_s16 = sshll.u32 %s1209_s3, 4  ;;  %s44_s13 = int_to_ptr.vmem [resolvable:$true] %s43_s13  ;;  %s27_s16 = int_to_ptr.hbm [resolvable:$true] %s26_s16 }
   0x3   :  { %s1114_s17 = smov 128   ;;  %s1115_s18 = smov 8  }
   0x4   :  { %49 = dma.hbm_to_vmem [thread:$0]  %s42_s11, 4096, %s44_s13, [#allocation5], %s1114_s17, %s1114_s17, %s1115_s18  }
   0x5   :  { %s1116_s19 = smov [#allocation2]   ;;  %s56_s23 = sshll.u32 %s1213_s7, 4  ;;  %s57_s23 = int_to_ptr.hbm [resolvable:$true] %s56_s23 }
   0x6   :  { %s28_s20 = sshll.u32 %s1116_s19, 4  ;;  %s1117_s5 = smov [#allocation6]   ;;  %s29_s20 = int_to_ptr.vmem [resolvable:$true] %s28_s20 }
   0x7   :  { %34 = dma.hbm_to_vmem [thread:$0]  %s27_s16, 2048, %s29_s20, [#allocation3], %s1114_s17, %s1114_s17, %s1115_s18  }
   0x8   :  { %s58_s24 = sshll.u32 %s1117_s5, 4  ;;  %s1118_s25 = smov 64   ;;  %s59_s24 = int_to_ptr.vmem [resolvable:$true] %s58_s24 }
   0x9   :  { %s1119_s26 = smov 4  }
   0xa   :  { %64 = dma.hbm_to_vmem [thread:$0]  %s57_s23, 2048, %s59_s24, [#allocation5], %s1118_s25, %s1118_s25, %s1119_s26  }
   0xb   :  { %1109 = dma.done.wait [#allocation3], 2048  }
   0xc   :  { %1110 = vsyncadd [#allocation3], 4294965248 }
   0xd   :  { %1111 = dma.done.wait [#allocation5], 6144  }
   0xe   :  { %1112 = vsyncadd [#allocation5], 4294961152  ;;  %v958_v0 = vld [vmem:[%s1207_s1 + $0x8] sm:$0xff]  ;;  %v957_v1 = vld [vmem:[%s1207_s1] sm:$0xff]  ;;  %vm103_vm0 = vcmask 261120  }
   0xf   :  { %v80_v2 = vld [vmem:[%s1206_s0] sm:$0xff]  ;;  %v81_v3 = vld [vmem:[%s1206_s0 + $0x8] sm:$0xff]  ;;  %v759_v4 = vld [vmem:[#allocation2 + $0x70] sm:$0xf]  ;;  %113 = vmatpush.bf16.msra.mxu0 %v958_v0 }
  0x10   :  { %v974_v5 = vld [vmem:[#allocation2 + $0x74] sm:$0xf0]  ;;  %v973_v7 = vld [vmem:[#allocation2 + $0x74] sm:$0xf]  ;;  %v761_v8 = vld [vmem:[#allocation2 + $0x78] sm:$0xf0]  ;;  %v82_v15 = vpack.c.bf16 %v81_v3, %v80_v2 }
  0x11   :  { %v760_v6 = vor.u32 %v974_v5, %v759_v4  ;;  %v751_v9 = vld [vmem:[#allocation2 + $0x60] sm:$0xf]  ;;  %v764_v10 = vor.u32 %v973_v7, %v761_v8  ;;  %v972_v11 = vld [vmem:[#allocation2 + $0x64] sm:$0xf0]  ;;  %v971_v12 = vld [vmem:[#allocation2 + $0x64] sm:$0xf] }
  0x12   :  { %v753_v13 = vld [vmem:[#allocation2 + $0x68] sm:$0xf0]  ;;  %v752_v14 = vor.u32 %v972_v11, %v751_v9  ;;  %v743_v17 = vld [vmem:[#allocation2 + $0x50] sm:$0xf]  ;;  %v970_v18 = vld [vmem:[#allocation2 + $0x54] sm:$0xf0] }
  0x13   :  { %226 = vmatpush.bf16.msra.mxu1 %v760_v6  ;;  %240 = vmatpush.bf16.msra.mxu2 %v764_v10  ;;  %v756_v16 = vor.u32 %v971_v12, %v753_v13  ;;  %v969_v19 = vld [vmem:[#allocation2 + $0x54] sm:$0xf]  ;;  %v745_v20 = vld [vmem:[#allocation2 + $0x58] sm:$0xf0]  ;;  %v744_v21 = vor.u32 %v970_v18, %v743_v17  ;;  %v735_v23 = vld [vmem:[#allocation2 + $0x40] sm:$0xf] }
  0x14   :  { %114 = vmatpush.bf16.msra.mxu0 %v957_v1  ;;  %v748_v22 = vor.u32 %v969_v19, %v745_v20  ;;  %v968_v24 = vld [vmem:[#allocation2 + $0x44] sm:$0xf0]  ;;  %v967_v25 = vld [vmem:[#allocation2 + $0x44] sm:$0xf]  ;;  %v737_v26 = vld [vmem:[#allocation2 + $0x48] sm:$0xf0] }
  0x15   :  { %v736_v27 = vor.u32 %v968_v24, %v735_v23  ;;  %v740_v28 = vor.u32 %v967_v25, %v737_v26  ;;  %v727_v29 = vld [vmem:[#allocation2 + $0x30] sm:$0xf]  ;;  %v966_v30 = vld [vmem:[#allocation2 + $0x34] sm:$0xf0]  ;;  %v965_v31 = vld [vmem:[#allocation2 + $0x34] sm:$0xf] }
  0x16   :  { %v728_v32 = vor.u32 %v966_v30, %v727_v29  ;;  %v729_v33 = vld [vmem:[#allocation2 + $0x38] sm:$0xf0]  ;;  %v719_v35 = vld [vmem:[#allocation2 + $0x20] sm:$0xf]  ;;  %v964_v36 = vld [vmem:[#allocation2 + $0x24] sm:$0xf0] }
  0x17   :  { %227 = vmatpush.bf16.msra.mxu1 %v752_v14  ;;  %700 = vmatmul.msk.bf16.vlgmr.msra.gmra.mxu0 %vm103_vm0, %v82_v15  ;;  %v732_v34 = vor.u32 %v965_v31, %v729_v33  ;;  %v963_v37 = vld [vmem:[#allocation2 + $0x24] sm:$0xf]  ;;  %v720_v38 = vor.u32 %v964_v36, %v719_v35  ;;  %v721_v39 = vld [vmem:[#allocation2 + $0x28] sm:$0xf0]  ;;  %v711_v41 = vld [vmem:[#allocation2 + $0x10] sm:$0xf] }
  0x18   :  { %241 = vmatpush.bf16.msra.mxu2 %v756_v16  ;;  %v724_v40 = vor.u32 %v963_v37, %v721_v39  ;;  %v962_v42 = vld [vmem:[#allocation2 + $0x14] sm:$0xf0]  ;;  %v961_v43 = vld [vmem:[#allocation2 + $0x14] sm:$0xf]  ;;  %v713_v45 = vld [vmem:[#allocation2 + $0x18] sm:$0xf0] }
  0x19   :  { %v712_v44 = vor.u32 %v962_v42, %v711_v41  ;;  %v716_v46 = vor.u32 %v961_v43, %v713_v45  ;;  %v703_v47 = vld [vmem:[#allocation2] sm:$0xf]  ;;  %v960_v48 = vld [vmem:[#allocation2 + $0x4] sm:$0xf0]  ;;  %v959_v49 = vld [vmem:[#allocation2 + $0x4] sm:$0xf] }
  0x1a   :  { %v704_v50 = vor.u32 %v960_v48, %v703_v47  ;;  %v705_v51 = vld [vmem:[#allocation2 + $0x8] sm:$0xf0]  ;;  %v823_v53 = vld [vmem:[#allocation4 + $0x70] sm:$0xf]  ;;  %v990_v54 = vld [vmem:[#allocation4 + $0x74] sm:$0xf0] }
  0x1b   :  { %228 = vmatpush.bf16.msra.mxu1 %v744_v21  ;;  %v708_v52 = vor.u32 %v959_v49, %v705_v51  ;;  %v989_v55 = vld [vmem:[#allocation4 + $0x74] sm:$0xf]  ;;  %v824_v56 = vor.u32 %v990_v54, %v823_v53  ;;  %v825_v57 = vld [vmem:[#allocation4 + $0x78] sm:$0xf0]  ;;  %v815_v58 = vld [vmem:[#allocation4 + $0x60] sm:$0xf] }
  0x1c   :  { %242 = vmatpush.bf16.msra.mxu2 %v748_v22  ;;  %v988_v59 = vld [vmem:[#allocation4 + $0x64] sm:$0xf0]  ;;  %v828_v60 = vor.u32 %v989_v55, %v825_v57  ;;  %v987_v61 = vld [vmem:[#allocation4 + $0x64] sm:$0xf]  ;;  %v817_v62 = vld [vmem:[#allocation4 + $0x68] sm:$0xf0] }
  0x1d   :  { %v887_v63 = vld [vmem:[#allocation4 + $0xf0] sm:$0xf]  ;;  %458 = vmatpush.bf16.msra.mxu3 %v824_v56  ;;  %v816_v0 = vor.u32 %v988_v59, %v815_v58  ;;  %v1006_v1 = vld [vmem:[#allocation4 + $0xf4] sm:$0xf0]  ;;  %v1005_v2 = vld [vmem:[#allocation4 + $0xf4] sm:$0xf]  ;;  %v820_v4 = vor.u32 %v987_v61, %v817_v62 }
  0x1e   :  { %v889_v3 = vld [vmem:[#allocation4 + $0xf8] sm:$0xf0]  ;;  %v888_v5 = vor.u32 %v1006_v1, %v887_v63  ;;  %v807_v7 = vld [vmem:[#allocation4 + $0x50] sm:$0xf]  ;;  %v986_v8 = vld [vmem:[#allocation4 + $0x54] sm:$0xf0] }
  0x1f   :  { %229 = vmatpush.bf16.msra.mxu1 %v736_v27  ;;  %v892_v6 = vor.u32 %v1005_v2, %v889_v3  ;;  %v985_v9 = vld [vmem:[#allocation4 + $0x54] sm:$0xf]  ;;  %v809_v10 = vld [vmem:[#allocation4 + $0x58] sm:$0xf0]  ;;  %v879_v11 = vld [vmem:[#allocation4 + $0xe0] sm:$0xf]  ;;  %v808_v16 = vor.u32 %v986_v8, %v807_v7 }
  0x20   :  { %243 = vmatpush.bf16.msra.mxu2 %v740_v28  ;;  %v1004_v12 = vld [vmem:[#allocation4 + $0xe4] sm:$0xf0]  ;;  %472 = vmatpush.bf16.msrb.mxu0 %v888_v5  ;;  %v1003_v14 = vld [vmem:[#allocation4 + $0xe4] sm:$0xf]  ;;  %v881_v15 = vld [vmem:[#allocation4 + $0xe8] sm:$0xf0]  ;;  %v812_v20 = vor.u32 %v985_v9, %v809_v10 }
  0x21   :  { %v880_v13 = vor.u32 %v1004_v12, %v879_v11  ;;  %459 = vmatpush.bf16.msra.mxu3 %v816_v0  ;;  %v884_v17 = vor.u32 %v1003_v14, %v881_v15  ;;  %v799_v18 = vld [vmem:[#allocation4 + $0x40] sm:$0xf]  ;;  %v984_v19 = vld [vmem:[#allocation4 + $0x44] sm:$0xf0]  ;;  %v871_v21 = vld [vmem:[#allocation4 + $0xd0] sm:$0xf] }
  0x22   :  { %v1002_v22 = vld [vmem:[#allocation4 + $0xd4] sm:$0xf0]  ;;  %v1001_v23 = vld [vmem:[#allocation4 + $0xd4] sm:$0xf]  ;;  %v983_v24 = vld [vmem:[#allocation4 + $0x44] sm:$0xf]  ;;  %v800_v29 = vor.u32 %v984_v19, %v799_v18 }
  0x23   :  { %230 = vmatpush.bf16.msra.mxu1 %v728_v32  ;;  %v801_v25 = vld [vmem:[#allocation4 + $0x48] sm:$0xf0]  ;;  %v873_v26 = vld [vmem:[#allocation4 + $0xd8] sm:$0xf0]  ;;  %v872_v27 = vor.u32 %v1002_v22, %v871_v21  ;;  %v1035_v32 = vld [vmem:[%s1208_s2] ss:$0 sm:$0xff] }
  0x24   :  { %244 = vmatpush.bf16.msra.mxu2 %v732_v34  ;;  %473 = vmatpush.bf16.msrb.mxu0 %v880_v13  ;;  %v876_v28 = vor.u32 %v1001_v23, %v873_v26  ;;  %v804_v30 = vor.u32 %v983_v24, %v801_v25  ;;  %v791_v39 = vld [vmem:[#allocation4 + $0x30] sm:$0xf]  ;;  %v981_v41 = vld [vmem:[#allocation4 + $0x34] sm:$0xf]  ;;  %v793_v43 = vld [vmem:[#allocation4 + $0x38] sm:$0xf0] }
  0x25   :  { %460 = vmatpush.bf16.msra.mxu3 %v808_v16  ;;  %v863_v45 = vld [vmem:[#allocation4 + $0xc0] sm:$0xf]  ;;  %v999_v47 = vld [vmem:[#allocation4 + $0xc4] sm:$0xf]  ;;  %v865_v49 = vld [vmem:[#allocation4 + $0xc8] sm:$0xf0] }
  0x26   :  { %v783_v51 = vld [vmem:[#allocation4 + $0x20] sm:$0xf]  ;;  %v979_v53 = vld [vmem:[#allocation4 + $0x24] sm:$0xf]  ;;  %v785_v55 = vld [vmem:[#allocation4 + $0x28] sm:$0xf0] }
  0x27   :  { %231 = vmatpush.bf16.msra.mxu1 %v720_v38  ;;  %v788_v56 = vor.u32 %v979_v53, %v785_v55  ;;  %v855_v57 = vld [vmem:[#allocation4 + $0xb0] sm:$0xf]  ;;  %v998_v58 = vld [vmem:[#allocation4 + $0xb4] sm:$0xf0]  ;;  %v857_v61 = vld [vmem:[#allocation4 + $0xb8] sm:$0xf0] }
  0x28   :  { %245 = vmatpush.bf16.msra.mxu2 %v724_v40  ;;  %474 = vmatpush.bf16.msrb.mxu0 %v872_v27  ;;  %v982_v40 = vld [vmem:[#allocation4 + $0x34] sm:$0xf0]  ;;  %v856_v59 = vor.u32 %v998_v58, %v855_v57  ;;  %v775_v63 = vld [vmem:[#allocation4 + $0x10] sm:$0xf]  ;;  %v977_v1 = vld [vmem:[#allocation4 + $0x14] sm:$0xf] }
  0x29   :  { %461 = vmatpush.bf16.msra.mxu3 %v800_v29  ;;  %v792_v42 = vor.u32 %v982_v40, %v791_v39  ;;  %v978_v0 = vld [vmem:[#allocation4 + $0x14] sm:$0xf0]  ;;  %v777_v3 = vld [vmem:[#allocation4 + $0x18] sm:$0xf0]  ;;  %v847_v5 = vld [vmem:[#allocation4 + $0xa0] sm:$0xf] }
  0x2a   :  { %v776_v2 = vor.u32 %v978_v0, %v775_v63  ;;  %v995_v7 = vld [vmem:[#allocation4 + $0xa4] sm:$0xf]  ;;  %v849_v9 = vld [vmem:[#allocation4 + $0xa8] sm:$0xf0]  ;;  %v767_v11 = vld [vmem:[#allocation4] sm:$0xf] }
  0x2b   :  { %232 = vmatpush.bf16.msra.mxu1 %v712_v44  ;;  %v796_v44 = vor.u32 %v981_v41, %v793_v43  ;;  %v852_v10 = vor.u32 %v995_v7, %v849_v9  ;;  %v976_v12 = vld [vmem:[#allocation4 + $0x4] sm:$0xf0]  ;;  %v975_v13 = vld [vmem:[#allocation4 + $0x4] sm:$0xf]  ;;  %v769_v15 = vld [vmem:[#allocation4 + $0x8] sm:$0xf0] }
  0x2c   :  { %246 = vmatpush.bf16.msra.mxu2 %v716_v46  ;;  %v1000_v46 = vld [vmem:[#allocation4 + $0xc4] sm:$0xf0]  ;;  %v768_v14 = vor.u32 %v976_v12, %v767_v11  ;;  %v772_v16 = vor.u32 %v975_v13, %v769_v15  ;;  %v994_v18 = vld [vmem:[#allocation4 + $0x94] sm:$0xf0]  ;;  %v993_v19 = vld [vmem:[#allocation4 + $0x94] sm:$0xf] }
  0x2d   :  { %462 = vmatpush.bf16.msra.mxu3 %v792_v42  ;;  %v864_v48 = vor.u32 %v1000_v46, %v863_v45  ;;  %v841_v21 = vld [vmem:[#allocation4 + $0x98] sm:$0xf0]  ;;  %v831_v23 = vld [vmem:[#allocation4 + $0x80] sm:$0xf]  ;;  %v992_v24 = vld [vmem:[#allocation4 + $0x84] sm:$0xf0] }
  0x2e   :  { %v844_v22 = vor.u32 %v993_v19, %v841_v21  ;;  %v991_v25 = vld [vmem:[#allocation4 + $0x84] sm:$0xf]  ;;  %v832_v26 = vor.u32 %v992_v24, %v831_v23  ;;  %v833_v27 = vld [vmem:[#allocation4 + $0x88] sm:$0xf0]  ;;  %v1014_v29 = vld [vmem:[#allocation6 + $0x38] sm:$0xff] }
  0x2f   :  { %233 = vmatpush.bf16.msra.mxu1 %v704_v50  ;;  %v868_v50 = vor.u32 %v999_v47, %v865_v49  ;;  %475 = vmatpush.bf16.msrb.mxu0 %v864_v48  ;;  %v1012_v49 = vld [vmem:[#allocation6 + $0x28] sm:$0xff]  ;;  %v1010_v53 = vld [vmem:[#allocation6 + $0x18] sm:$0xff]  ;;  %v1009_v55 = vld [vmem:[#allocation6 + $0x10] sm:$0xff] }
  0x30   :  { %247 = vmatpush.bf16.msra.mxu2 %v708_v52  ;;  %v980_v52 = vld [vmem:[#allocation4 + $0x24] sm:$0xf0]  ;;  %v1017_v58 = vld [vmem:[#allocation6 + $0x50] sm:$0xff]  ;;  %v292_v63 = vld [vmem:[%s1212_s6] sm:$0x3] }
  0x31   :  { %v784_v54 = vor.u32 %v980_v52, %v783_v51  ;;  %v1011_v51 = vld [vmem:[#allocation6 + $0x20] sm:$0xff]  ;;  %v1020_v52 = vld [vmem:[#allocation6 + $0x68] sm:$0xff] }
  0x32   :  { %v1008_v57 = vld [vmem:[#allocation6 + $0x8] sm:$0xff] }
  0x33   :  { %486 = vmatpush.bf16.msrb.mxu1 %v828_v60  ;;  %463 = vmatpush.bf16.msra.mxu3 %v784_v54  ;;  %v997_v60 = vld [vmem:[#allocation4 + $0xb4] sm:$0xf]  ;;  %v1019_v54 = vld [vmem:[#allocation6 + $0x60] sm:$0xff] }
  0x34   :  { %500 = vmatpush.bf16.msrb.mxu2 %v892_v6  ;;  %v860_v62 = vor.u32 %v997_v60, %v857_v61  ;;  %476 = vmatpush.bf16.msrb.mxu0 %v856_v59  ;;  %v996_v6 = vld [vmem:[#allocation4 + $0xa4] sm:$0xf0]  ;;  %v1007_v59 = vld [vmem:[#allocation6] sm:$0xff] }
  0x35   :  { %v848_v8 = vor.u32 %v996_v6, %v847_v5  ;;  %v1016_v60 = vld [vmem:[#allocation6 + $0x48] sm:$0xff]  ;;  %v1015_v61 = vld [vmem:[#allocation6 + $0x40] sm:$0xff]  ;;  %v295_v5 = vperm.slane %v292_v63, 1 }
  0x37   :  { %487 = vmatpush.bf16.msrb.mxu1 %v820_v4  ;;  %v780_v4 = vor.u32 %v977_v1, %v777_v3  ;;  %464 = vmatpush.bf16.msra.mxu3 %v776_v2  ;;  %v294_v2 = vperm.slane %v292_v63, 0 }
  0x38   :  { %501 = vmatpush.bf16.msrb.mxu2 %v884_v17  ;;  %477 = vmatpush.bf16.msrb.mxu0 %v848_v8  ;;  %v839_v17 = vld [vmem:[#allocation4 + $0x90] sm:$0xf] }
  0x3b   :  { %488 = vmatpush.bf16.msrb.mxu1 %v812_v20  ;;  %465 = vmatpush.bf16.msra.mxu3 %v768_v14  ;;  %v840_v20 = vor.u32 %v994_v18, %v839_v17 }
  0x3c   :  { %502 = vmatpush.bf16.msrb.mxu2 %v876_v28  ;;  %v836_v28 = vor.u32 %v991_v25, %v833_v27  ;;  %v1036_v25 = vld [vmem:[%s1214_s8] ss:$0 sm:$0xff] }
  0x3d   :  { %478 = vmatpush.bf16.msrb.mxu0 %v840_v20 }
  0x3f   :  { %489 = vmatpush.bf16.msrb.mxu1 %v804_v30  ;;  %v1022_v30 = vld [vmem:[#allocation6 + $0x78] sm:$0xff]  ;;  %652 = vmatpush.bf16.msrb.mxu3 %v1014_v29 }
  0x40   :  { %503 = vmatpush.bf16.msrb.mxu2 %v868_v50  ;;  %v1021_v50 = vld [vmem:[#allocation6 + $0x70] sm:$0xff] }
  0x41   :  { %479 = vmatpush.bf16.msrb.mxu0 %v832_v26 }
  0x43   :  { %490 = vmatpush.bf16.msrb.mxu1 %v796_v44 }
  0x44   :  { %504 = vmatpush.bf16.msrb.mxu2 %v860_v62 }
  0x45   :  { %666 = vmatpush.bf16.msra.mxu0 %v1022_v30 }
  0x47   :  { %491 = vmatpush.bf16.msrb.mxu1 %v788_v56  ;;  %v1018_v56 = vld [vmem:[#allocation6 + $0x58] sm:$0xff] }
  0x48   :  { %505 = vmatpush.bf16.msrb.mxu2 %v852_v10 }
  0x49   :  { %667 = vmatpush.bf16.msra.mxu0 %v1021_v50 }
  0x4b   :  { %492 = vmatpush.bf16.msrb.mxu1 %v780_v4 }
  0x4c   :  { %506 = vmatpush.bf16.msrb.mxu2 %v844_v22 }
  0x4d   :  { %668 = vmatpush.bf16.msra.mxu0 %v1020_v52 }
  0x4f   :  { %493 = vmatpush.bf16.msrb.mxu1 %v772_v16 }
  0x50   :  { %507 = vmatpush.bf16.msrb.mxu2 %v836_v28 }
  0x51   :  { %669 = vmatpush.bf16.msra.mxu0 %v1019_v54 }
  0x55   :  { %670 = vmatpush.bf16.msra.mxu0 %v1018_v56 }
  0x59   :  { %671 = vmatpush.bf16.msra.mxu0 %v1017_v58 }
  0x5d   :  { %672 = vmatpush.bf16.msra.mxu0 %v1016_v60 }
  0x61   :  { %673 = vmatpush.bf16.msra.mxu0 %v1015_v61 }
  0x94   :  { %v116_v31 = vpop.f32.mrf.mxu0 }
  0x95   :  { %v117_v33 = vadd.f32 %v1035_v32, %v116_v31  ;;  %v1013_v31 = vld [vmem:[#allocation6 + $0x30] sm:$0xff] }
  0x96   :  { %653 = vmatpush.bf16.msrb.mxu3 %v1013_v31 }
  0x97   :  { %v121_v36 = vmax.f32 %v117_v33, 0.0 }
  0x9a   :  { %654 = vmatpush.bf16.msrb.mxu3 %v1012_v49 }
  0x9c   :  { %v118_v34 = vpop.f32.mrf.mxu0 }
  0x9d   :  { %v119_v35 = vadd.f32 %v1035_v32, %v118_v34  ;;  %v140_v32 = vld [vmem:[%s1210_s4] sm:$0x3] }
  0x9e   :  { %v142_v34 = vperm.slane %v140_v32, 0  ;;  %655 = vmatpush.bf16.msrb.mxu3 %v1011_v51 }
  0x9f   :  { %v122_v37 = vmax.f32 %v119_v35, 0.0 }
  0xa1   :  { %v123_v38 = vpack.c.bf16 %v122_v37, %v121_v36 }
  0xa2   :  { %656 = vmatpush.bf16.msrb.mxu3 %v1010_v53 }
  0xa3   :  { %234 = vmatmul.bf16.vlgmr.msra.gmra.mxu1 %v123_v38  ;;  %248 = vmatmul.bf16.vlgmr.msra.gmra.mxu2 %v123_v38  ;;  %v143_v38 = vperm.slane %v140_v32, 1 }
  0xa6   :  { %657 = vmatpush.bf16.msrb.mxu3 %v1009_v55 }
  0xaa   :  { %658 = vmatpush.bf16.msrb.mxu3 %v1008_v57 }
  0xae   :  { %659 = vmatpush.bf16.msrb.mxu3 %v1007_v59 }
 0x120   :  { %v235_v33 = vpop.f32.mrf.mxu1 }
 0x121   :  { %v236_v36 = vadd.f32 %v235_v33, %v142_v34 }
 0x123   :  { %v254_v40 = vmax.f32 %v236_v36, 0.0 }
 0x126   :  { %v249_v35 = vpop.f32.mrf.mxu2 }
 0x127   :  { %v250_v42 = vadd.f32 %v249_v35, %v143_v38 }
 0x128   :  { %v237_v37 = vpop.f32.mrf.mxu1 }
 0x129   :  { %v238_v39 = vadd.f32 %v237_v37, %v142_v34  ;;  %v255_v46 = vmax.f32 %v250_v42, 0.0 }
 0x12b   :  { %v256_v41 = vmax.f32 %v238_v39, 0.0 }
 0x12d   :  { %v258_v43 = vpack.c.bf16 %v256_v41, %v254_v40 }
 0x12e   :  { %v251_v44 = vpop.f32.mrf.mxu2 }
 0x12f   :  { %v252_v45 = vadd.f32 %v251_v44, %v143_v38  ;;  %466 = vmatmul.bf16.vlgmr.msra.gmra.mxu3 %v258_v43  ;;  %494 = vmatmul.bf16.vlgmr.msrb.gmra.mxu1 %v258_v43 }
 0x131   :  { %v257_v47 = vmax.f32 %v252_v45, 0.0 }
 0x133   :  { %v259_v48 = vpack.c.bf16 %v257_v47, %v255_v46 }
 0x135   :  { %480 = vmatmul.bf16.vlgmr.msrb.gmra.mxu0 %v259_v48  ;;  %508 = vmatmul.bf16.vlgmr.msrb.gmra.mxu2 %v259_v48 }
 0x1ac   :  { %v495_v62 = vpop.f32.mrf.mxu1 }
 0x1ad   :  { %v496_v11 = vadd.f32 %v495_v62, %v295_v5 }
 0x1b2   :  { %v467_v0 = vpop.f32.mrf.mxu3  ;;  %v481_v1 = vpop.f32.mrf.mxu0 }
 0x1b3   :  { %v468_v3 = vadd.f32 %v467_v0, %v294_v2 }
 0x1b4   :  { %v497_v9 = vpop.f32.mrf.mxu1 }
 0x1b5   :  { %v482_v7 = vadd.f32 %v481_v1, %v468_v3  ;;  %v498_v14 = vadd.f32 %v497_v9, %v295_v5 }
 0x1b7   :  { %v514_v13 = vmax.f32 %v482_v7, 0.0 }
 0x1b8   :  { %v509_v4 = vpop.f32.mrf.mxu2 }
 0x1b9   :  { %v510_v15 = vadd.f32 %v509_v4, %v496_v11 }
 0x1ba   :  { %v469_v6 = vpop.f32.mrf.mxu3  ;;  %v483_v10 = vpop.f32.mrf.mxu0 }
 0x1bb   :  { %v470_v8 = vadd.f32 %v469_v6, %v294_v2  ;;  %v515_v20 = vmax.f32 %v510_v15, 0.0 }
 0x1bd   :  { %v484_v12 = vadd.f32 %v483_v10, %v470_v8 }
 0x1bf   :  { %v516_v16 = vmax.f32 %v484_v12, 0.0 }
 0x1c0   :  { %v511_v17 = vpop.f32.mrf.mxu2 }
 0x1c1   :  { %v518_v18 = vpack.c.bf16 %v516_v16, %v514_v13  ;;  %v512_v19 = vadd.f32 %v511_v17, %v498_v14 }
 0x1c3   :  { %v517_v21 = vmax.f32 %v512_v19, 0.0  ;;  %660 = vmatmul.bf16.vlgmr.msrb.gmra.mxu3 %v518_v18 }
 0x1c5   :  { %v519_v22 = vpack.c.bf16 %v517_v21, %v515_v20 }
 0x1c7   :  { %674 = vmatmul.bf16.vlgmr.msra.gmra.mxu0 %v519_v22 }
 0x244   :  { %v675_v23 = vpop.f32.mrf.mxu0 }
 0x246   :  { %v661_v24 = vpop.f32.mrf.mxu3 }
 0x247   :  { %v662_v26 = vadd.f32 %v1036_v25, %v661_v24 }
 0x249   :  { %v676_v28 = vadd.f32 %v675_v23, %v662_v26 }
 0x24b   :  { %v680_v32 = vmax.f32 %v676_v28, 0.0 }
 0x24c   :  { %v677_v30 = vpop.f32.mrf.mxu0 }
 0x24e   :  { %v663_v27 = vpop.f32.mrf.mxu3 }
 0x24f   :  { %v664_v29 = vadd.f32 %v1036_v25, %v663_v27 }
 0x251   :  { %v678_v31 = vadd.f32 %v677_v30, %v664_v29 }
 0x253   :  { %v681_v33 = vmax.f32 %v678_v31, 0.0 }
 0x255   :  { %v1026_v34 = vpack.c.bf16 %v681_v33, %v680_v32 }
 0x257   :  { %1027 = vst [vmem:[%s1215_s9] sm:$0xff] %v1026_v34  }
 0x258   :  { %690 = vsyncpa [#allocation3], 1 }
 0x259   :  { %691 = vsyncpa [#allocation5], 1 }

</bundles_post_ra>
